<compile_context>
chip_gen: v6e
topology: v6e:2x2x1
jax: 0.10.0
libtpu: 0.0.40
codegen_flags: <defaults>
</compile_context>

<pallas_src>
import functools

import jax
import jax.numpy as jnp
from jax.experimental import pallas as pl
from jax.experimental.pallas import tpu as pltpu

LANES = 128
MAX_TILE_ROWS = 1024  # (1024, 128) f32 block = 512 KiB


def _sinh_arcsinh_kernel(ab_ref, f_ref, o_ref, *, add_init_f0):
    """fk = sinh(b * asinh(f) - a) on one (tile_rows, 128) tile.

    ab_ref : SMEM (2,)  -> [a, b_effective]  (softplus already applied outside)
    f_ref  : VMEM (tile_rows, 128)
    o_ref  : VMEM (tile_rows, 128)
    """
    a = ab_ref[0]
    b = ab_ref[1]

    f = f_ref[...].astype(jnp.float32)
    # asinh(f) = log(f + sqrt(f^2 + 1)), matching the module's custom asinh.
    asinh_f = jnp.log(f + jnp.sqrt(f * f + 1.0))
    x = b * asinh_f - a
    # sinh(x) = (exp(x) - exp(-x)) / 2   (two EUP exps; guaranteed lowering)
    fk = 0.5 * (jnp.exp(x) - jnp.exp(-x))
    if add_init_f0:
        fk = fk + f
    o_ref[...] = fk.astype(o_ref.dtype)


def _sinh_arcsinh_jnp(f, a, b_eff, add_init_f0):
    """Plain-XLA tail path (for the < 128-element remainder, if any)."""
    asinh_f = jnp.log(f + jnp.sqrt(f * f + 1.0))
    fk = jnp.sinh(b_eff * asinh_f - a)
    return fk + f if add_init_f0 else fk


def sinh_arcsinh_flow_forward(f0, a, b, *, set_restrictions=True, add_init_f0=False):
    """Apply Sinh_ArcsinhFlow.forward elementwise to `f0` (any shape) via Pallas."""
    orig_shape = f0.shape
    dtype = f0.dtype

    # Hoisted scalar prep: softplus(b) / parameter packing done once, not per tile.
    a32 = jnp.asarray(a, jnp.float32).reshape(())
    b32 = jnp.asarray(b, jnp.float32).reshape(())
    b_eff = jax.nn.softplus(b32) if set_restrictions else b32
    ab = jnp.stack([a32, b_eff])

    flat = f0.reshape(-1)
    n = flat.shape[0]
    rows = n // LANES
    rem = n - rows * LANES

    pieces = []
    if rows > 0:
        bulk = flat if rem == 0 else flat[: rows * LANES]
        slab = bulk.reshape(rows, LANES)

        # Big lane-dense tiles; rows per tile is a multiple of 8.  Trailing
        # partial block (rows % tile_rows != 0) is masked by Pallas.
        tile_rows = min(MAX_TILE_ROWS, ((rows + 7) // 8) * 8)
        grid = (pl.cdiv(rows, tile_rows),)

        itemsize = jnp.dtype(dtype).itemsize
        n_bulk = rows * LANES
        cost = pl.CostEstimate(
            flops=6 * n_bulk,
            transcendentals=4 * n_bulk,
            bytes_accessed=2 * n_bulk * itemsize,
        )

        kernel = functools.partial(_sinh_arcsinh_kernel, add_init_f0=add_init_f0)
        out_slab = pl.pallas_call(
            kernel,
            out_shape=jax.ShapeDtypeStruct((rows, LANES), dtype),
            grid_spec=pltpu.PrefetchScalarGridSpec(
                num_scalar_prefetch=0,
                grid=grid,
                in_specs=[
                    pl.BlockSpec(memory_space=pltpu.SMEM),               # [a, b] scalars
                    pl.BlockSpec((tile_rows, LANES), lambda i: (i, 0)),  # f tile
                ],
                out_specs=pl.BlockSpec((tile_rows, LANES), lambda i: (i, 0)),
            ),
            compiler_params=pltpu.CompilerParams(
                dimension_semantics=("parallel",),  # shards across both TCs on v7x
            ),
            cost_estimate=cost,
        )(ab, slab)
        pieces.append(out_slab.reshape(-1))

    if rem > 0:
        # Tiny tail (< 128 elements): plain XLA instead of padding the full tensor.
        tail = flat[rows * LANES:]
        tail_out = _sinh_arcsinh_jnp(tail.astype(jnp.float32), a32, b_eff, add_init_f0)
        pieces.append(tail_out.astype(dtype))

    out = pieces[0] if len(pieces) == 1 else jnp.concatenate(pieces)
    return out.reshape(orig_shape)


def sinh_arcsinh_flow_reference(f0, a, b, *, set_restrictions=True, add_init_f0=False):
    """Plain-JAX reference mirroring the PyTorch forward exactly."""
    b_eff = jax.nn.softplus(b) if set_restrictions else b
    asinh_f = jnp.log(f0 + jnp.sqrt(f0 ** 2 + 1.0))
    fk = jnp.sinh(b_eff * asinh_f - a)
    return fk + f0 if add_init_f0 else fk


if __name__ == "__main__":
    key = jax.random.PRNGKey(0)

    # Deterministic "parameter init" matching Sinh_ArcsinhFlow(init_a, init_b, ...)
    init_a = 0.3
    init_b = 1.2

    # Small NCHW-style input; the flow is applied elementwise.
    x = jax.random.normal(key, (2, 4, 16, 16), dtype=jnp.float32)

    # Config 1: set_restrictions=True, add_init_f0=False
    out1 = sinh_arcsinh_flow_forward(
        x, init_a, init_b, set_restrictions=True, add_init_f0=False)
    out1 = jax.block_until_ready(out1)
    ref1 = sinh_arcsinh_flow_reference(
        x, jnp.float32(init_a), jnp.float32(init_b),
        set_restrictions=True, add_init_f0=False)
    assert out1.shape == x.shape
    assert jnp.allclose(out1, ref1, atol=1e-5, rtol=1e-5), (
        f"max abs err = {jnp.max(jnp.abs(out1 - ref1))}"
    )

    # Config 2: add_init_f0=True (module forces set_restrictions=True)
    out2 = sinh_arcsinh_flow_forward(
        x, init_a, init_b, set_restrictions=True, add_init_f0=True)
    out2 = jax.block_until_ready(out2)
    ref2 = sinh_arcsinh_flow_reference(
        x, jnp.float32(init_a), jnp.float32(init_b),
        set_restrictions=True, add_init_f0=True)
    assert jnp.allclose(out2, ref2, atol=1e-5, rtol=1e-5), (
        f"max abs err = {jnp.max(jnp.abs(out2 - ref2))}"
    )

    print("KERNEL_OK")
</pallas_src>

<mosaic_0001>
module attributes {stable_mosaic.version = 11 : i64} {
  func.func @_sinh_arcsinh_kernel(%arg0: i32, %arg1: memref<2xf32, #tpu.memory_space<smem>>, %arg2: memref<16x128xf32, #tpu.memory_space<vmem>>, %arg3: memref<16x128xf32, #tpu.memory_space<vmem>>) attributes {dimension_semantics = [#tpu.dimension_semantics<parallel>], iteration_bounds = array<i64: 1>, scalar_prefetch = 0 : i64, scratch_operands = 0 : i64, tpu.core_type = #tpu.core_type<tc>, window_params = [{transform_indices = @transform_0, window_bounds = array<i64: 2>}, {transform_indices = @transform_1, window_bounds = array<i64: 16, 128>}, {transform_indices = @transform_2, window_bounds = array<i64: 16, 128>}]} {
    %c0 = arith.constant 0 : index
    %0 = memref.load %arg1[%c0] : memref<2xf32, #tpu.memory_space<smem>>
    %c1 = arith.constant 1 : index
    %1 = memref.load %arg1[%c1] : memref<2xf32, #tpu.memory_space<smem>>
    %c0_0 = arith.constant 0 : index
    %c0_1 = arith.constant 0 : index
    %2 = vector.load %arg2[%c0_0, %c0_1] : memref<16x128xf32, #tpu.memory_space<vmem>>, vector<16x128xf32>
    %3 = arith.mulf %2, %2 : vector<16x128xf32>
    %cst = arith.constant 1.000000e+00 : f32
    %4 = vector.broadcast %cst : f32 to vector<16x128xf32>
    %5 = arith.addf %3, %4 : vector<16x128xf32>
    %6 = math.sqrt %5 : vector<16x128xf32>
    %7 = arith.addf %2, %6 : vector<16x128xf32>
    %8 = math.log %7 : vector<16x128xf32>
    %9 = vector.broadcast %1 : f32 to vector<16x128xf32>
    %10 = arith.mulf %9, %8 : vector<16x128xf32>
    %11 = vector.broadcast %0 : f32 to vector<16x128xf32>
    %12 = arith.subf %10, %11 : vector<16x128xf32>
    %13 = math.exp %12 : vector<16x128xf32>
    %cst_2 = arith.constant 0.000000e+00 : f32
    %14 = vector.broadcast %cst_2 : f32 to vector<16x128xf32>
    %15 = arith.subf %14, %12 : vector<16x128xf32>
    %16 = math.exp %15 : vector<16x128xf32>
    %17 = arith.subf %13, %16 : vector<16x128xf32>
    %cst_3 = arith.constant 5.000000e-01 : f32
    %18 = vector.broadcast %cst_3 : f32 to vector<16x128xf32>
    %19 = arith.mulf %18, %17 : vector<16x128xf32>
    %c0_4 = arith.constant 0 : index
    %c0_5 = arith.constant 0 : index
    %20 = vector.load %arg3[%c0_4, %c0_5] : memref<16x128xf32, #tpu.memory_space<vmem>>, vector<16x128xf32>
    tpu.vector_store %arg3[%c0_4, %c0_5], %19 {strides = array<i32>} : memref<16x128xf32, #tpu.memory_space<vmem>>, vector<16x128xf32>,
    return
  }
  func.func @transform_0(%arg0: i32) -> i32 {
    %c0_i32 = arith.constant 0 : i32
    %c0_i32_0 = arith.constant 0 : i32
    return %c0_i32 : i32
  }
  func.func @transform_1(%arg0: i32) -> (i32, i32) {
    %c0_i32 = arith.constant 0 : i32
    %c0_i32_0 = arith.constant 0 : i32
    return %arg0, %c0_i32 : i32, i32
  }
  func.func @transform_2(%arg0: i32) -> (i32, i32) {
    %c0_i32 = arith.constant 0 : i32
    %c0_i32_0 = arith.constant 0 : i32
    return %arg0, %c0_i32 : i32, i32
  }
}

</mosaic_0001>

<bundles_post_ra>
// kernel: tpu_custom_call.1
= control target key start
LH: loop header
LB: loop body
LE: loop exit
PB: predicated region body
PF: predicated region fallthrough
CT: control target
= control target key end

     0   :  { %7 = vsyncpa [#allocation5], 0  ;;  %s216_s0 = inlined_call_operand.hbm [shape: f32[2], index: 0, kind: input, shape index: {}]   ;;  %s217_s1 = inlined_call_operand.hbm [shape: f32[16,128], index: 1, kind: input, shape index: {}]   ;;  %s218_s2 = inlined_call_operand.hbm [shape: f32[16,128], index: 2, kind: output, shape index: {}]  }
   0x1   :  { %8 = vsyncpa [#allocation3], 0 }
   0x2   :  { %9 = vsyncpa [#allocation4], 0  ;;  %s181_s9 = smov [#allocation2]   ;;  %s182_s12 = smov [#allocation6]  }
   0x3   :  { %17 = dma.hbm_to_smem %s216_s0, 16, %s181_s9, [#allocation5]  }
   0x4   :  { %s23_s13 = sshll.u32 %s182_s12, 4  ;;  %s24_s13 = int_to_ptr.vmem [resolvable:$true] %s23_s13 }
   0x5   :  { %s143_s14 = scalar_lea.vmem %s24_s13, 256  ;;  %p148_p1 = scmp.lt.s32.totalorder %s24_s13, %s24_s13 }
   0x6   :  { %p144_p0 = scmp.ne.s32.totalorder %s24_s13, %s143_s14  ;;  %p149_p2 = scmp.lt.s32.totalorder %s143_s14, %s143_s14 }
   0x8   :  { %p150_p3 = por %p149_p2, %p148_p1 }
   0xa   :  { %p151_p4 = pnand %p150_p3, %p144_p0 }
   0xc   :  { %154 = shalt.err (!%p151_p4)
}
   0xd   :  { %s183_s15 = smov 128   ;;  %s184_s16 = smov 8  }
   0xe   :  { %29 = dma.hbm_to_vmem [thread:$0]  %s217_s1, 256, %s24_s13, [#allocation3], %s183_s15, %s183_s15, %s184_s16  }
   0xf   :  { %175 = dma.done.wait [#allocation5], 16  }
  0x10   :  { %176 = vsyncadd [#allocation5], 4294967280 }
  0x11   :  { %177 = dma.done.wait [#allocation3], 256  }
  0x12   :  { %178 = vsyncadd [#allocation3], 4294967040 }
  0x13   :  { %36 = sfence }
  0x14   :  { %v39_v0 = vld [vmem:[#allocation6] sm:$0xff]  ;;  %v40_v1 = vld [vmem:[#allocation6 + $0x8] sm:$0xff]  ;;  %s105_s0 = sld [smem:[#allocation2 + $0x1]]  ;;  %s185_s19 = smov [#allocation7]  }
  0x15   :  { %v41_v2 = vmul.f32 %v39_v0, %v39_v0  ;;  %v42_v3 = vmul.f32 %v40_v1, %v40_v1  ;;  %s37_s1 = sld [smem:[#allocation2]]  ;;  %s92_s20 = sshll.u32 %s185_s19, 4  ;;  %s93_s20 = int_to_ptr.vmem [resolvable:$true] %s92_s20 }
  0x16   :  { %s155_s21 = scalar_lea.vmem %s93_s20, 256  ;;  %p160_p6 = scmp.lt.s32.totalorder %s93_s20, %s93_s20 }
  0x17   :  { %v43_v4 = vadd.f32 1.0, %v41_v2  ;;  %v44_v5 = vadd.f32 1.0, %v42_v3  ;;  %p156_p5 = scmp.ne.s32.totalorder %s93_s20, %s155_s21  ;;  %p161_p7 = scmp.lt.s32.totalorder %s155_s21, %s155_s21 }
  0x19   :  { %111 = vrsqrt.f32 %v43_v4  ;;  %vm47_vm0 = vcmp.eq.f32.partialorder %v43_v4, inf  ;;  %v50_v7 = vand.u32 2147483648, %v43_v4  ;;  %vm49_vm1 = vcmp.eq.f32.partialorder %v43_v4, 0.0  ;;  %p162_p8 = por %p161_p7, %p160_p6 }
  0x1a   :  { %113 = vrsqrt.f32 %v44_v5  ;;  %vm54_vm2 = vcmp.eq.f32.partialorder %v44_v5, inf  ;;  %v57_v10 = vand.u32 2147483648, %v44_v5  ;;  %vm56_vm3 = vcmp.eq.f32.partialorder %v44_v5, 0.0 }
  0x1b   :  { %v65_v19 = vstv %s105_s0  ;;  %v68_v22 = vstv %s37_s1  ;;  %p163_p9 = pnand %p162_p8, %p156_p5 }
  0x26   :  { %v112_v6 = vpop.eup %111 }
  0x27   :  { %v114_v8 = vpop.eup %113  ;;  %v46_v9 = vmul.f32 %v112_v6, %v43_v4 }
  0x28   :  { %v53_v11 = vmul.f32 %v114_v8, %v44_v5 }
  0x29   :  { %v48_v12 = vsel %vm47_vm0, %v43_v4, %v46_v9 }
  0x2a   :  { %v51_v13 = vsel %vm49_vm1, %v50_v7, %v48_v12  ;;  %v55_v14 = vsel %vm54_vm2, %v44_v5, %v53_v11 }
  0x2b   :  { %v59_v15 = vadd.f32 %v51_v13, %v39_v0  ;;  %v58_v16 = vsel %vm56_vm3, %v57_v10, %v55_v14 }
  0x2c   :  { %v60_v17 = vadd.f32 %v58_v16, %v40_v1 }
  0x2d   :  { %115 = vlog2.f32 %v59_v15 }
  0x2e   :  { %117 = vlog2.f32 %v60_v17 }
  0x3a   :  { %v116_v18 = vpop.eup %115 }
  0x3b   :  { %v118_v20 = vpop.eup %117  ;;  %v62_v21 = vmul.f32 0.6931472, %v116_v18 }
  0x3c   :  { %v64_v23 = vmul.f32 0.6931472, %v118_v20 }
  0x3d   :  { %v66_v24 = vmul.f32 %v65_v19, %v62_v21 }
  0x3e   :  { %v67_v25 = vmul.f32 %v65_v19, %v64_v23 }
  0x3f   :  { %v69_v26 = vsub.f32 %v66_v24, %v68_v22 }
  0x40   :  { %v70_v27 = vsub.f32 %v67_v25, %v68_v22 }
  0x41   :  { %v71_v28 = vmul.f32 1.442695, %v69_v26  ;;  %v75_v29 = vsub.f32 0.0, %v69_v26 }
  0x42   :  { %v73_v30 = vmul.f32 1.442695, %v70_v27  ;;  %v76_v31 = vsub.f32 0.0, %v70_v27 }
  0x43   :  { %119 = vpow2.f32 %v71_v28  ;;  %v77_v32 = vmul.f32 1.442695, %v75_v29 }
  0x44   :  { %121 = vpow2.f32 %v73_v30  ;;  %v79_v33 = vmul.f32 1.442695, %v76_v31 }
  0x45   :  { %123 = vpow2.f32 %v77_v32 }
  0x46   :  { %125 = vpow2.f32 %v79_v33 }
  0x50   :  { %v120_v34 = vpop.eup %119 }
  0x51   :  { %v122_v35 = vpop.eup %121 }
  0x52   :  { %v124_v36 = vpop.eup %123 }
  0x53   :  { %v126_v37 = vpop.eup %125  ;;  %v81_v38 = vsub.f32 %v120_v34, %v124_v36 }
  0x54   :  { %v82_v39 = vsub.f32 %v122_v35, %v126_v37 }
  0x55   :  { %v83_v40 = vmul.f32 0.5, %v81_v38 }
  0x56   :  { %v84_v41 = vmul.f32 0.5, %v82_v39 }
  0x57   :  { %85 = vst [vmem:[#allocation7] sm:$0xff] %v83_v40 }
  0x58   :  { %86 = vst [vmem:[#allocation7 + $0x8] sm:$0xff] %v84_v41 }
  0x59   :  { %166 = shalt.err (!%p163_p9)
}
  0x5a   :  { %98 = dma.vmem_to_hbm [thread:$0]  %s93_s20, 256, %s218_s2, [#allocation4], %s183_s15, %s183_s15, %s184_s16  }
  0x5b   :  { %179 = dma.done.wait [#allocation4], 256  }
  0x5c   :  { %180 = vsyncadd [#allocation4], 4294967040 }
  0x5d   :  { %102 = vsyncpa [#allocation3], 1 }
  0x5e   :  { %103 = vsyncpa [#allocation4], 1 }
  0x5f   :  { %104 = vsyncpa [#allocation5], 1 }

</bundles_post_ra>
